<compile_context>
chip_gen: v6e
topology: v6e:2x2x1
jax: 0.10.0
libtpu: 0.0.40
codegen_flags: <defaults>
</compile_context>

<pallas_src>
import numpy as np

import jax
import jax.numpy as jnp
from jax.experimental import pallas as pl
from jax.experimental.pallas import tpu as pltpu

_LANES = 128
_BOXES_PER_ROW = _LANES // 4  # 32 boxes per 128-lane row


def _clip_boxes_kernel(x_ref, lo_ref, hi_ref, o_ref):
    # One max + one min per vreg against (1, 128) bound rows (broadcast over
    # sublanes) — 2 VPU ops, kernel stays purely DMA-bound.
    o_ref[...] = jnp.minimum(jnp.maximum(x_ref[...], lo_ref[...]), hi_ref[...])


def _round_up(x, m):
    return -(-x // m) * m


def _sublane_multiple(dtype):
    # f32 -> 8, bf16 -> 16, int8/fp8 -> 32 rows per full vreg tile.
    itemsize = jnp.dtype(dtype).itemsize
    return max(8, 8 * (4 // max(itemsize, 1)))


def _bounds(dtype, width, height):
    """(1, 128) per-lane lower/upper clamp vectors, repeated for 32 boxes/row."""
    dt = jnp.dtype(dtype)
    if jnp.issubdtype(dt, jnp.floating):
        lo_sent = float(jnp.finfo(dt).min)
        hi_sent = float(jnp.finfo(dt).max)
    else:
        lo_sent = int(jnp.iinfo(dt).min)
        hi_sent = int(jnp.iinfo(dt).max)
    lower = (
        np.tile(np.array([0, 0, lo_sent, lo_sent]), _BOXES_PER_ROW)
        .astype(dt)
        .reshape(1, _LANES)
    )
    upper = (
        np.tile(np.array([hi_sent, hi_sent, width, height]), _BOXES_PER_ROW)
        .astype(dt)
        .reshape(1, _LANES)
    )
    return jnp.asarray(lower), jnp.asarray(upper)


def clip_boxes(boxes, img, *, block_rows=2048):
    """Functional equivalent of ClipBoxes.forward(boxes, img).

    boxes: [B, N, 4] with coords (x1, y1, x2, y2); img: [B, C, H, W]
    (only its static H / W are used). Returns the clipped boxes.
    """
    _, _, height, width = img.shape  # static Python ints
    B, N, C = boxes.shape
    assert C == 4, "boxes last dim must be 4 (x1, y1, x2, y2)"
    dtype = boxes.dtype

    lower, upper = _bounds(dtype, width, height)

    # Lane-dense view: the whole slab as [rows, 128] (32 boxes per row).
    n_elems = B * N * 4
    rows = pl.cdiv(n_elems, _LANES)
    sub = _sublane_multiple(dtype)

    block_rows = max(sub, min(_round_up(block_rows, sub), _round_up(rows, sub)))
    # Keep >= 2 grid blocks when the slab is big enough so the "parallel" axis
    # actually shards across TensorCores and double-buffering stays active.
    if rows > 2 * sub and rows <= block_rows:
        block_rows = max(sub, _round_up(pl.cdiv(rows, 2), sub))

    pad = rows * _LANES - n_elems
    if pad == 0:
        # Aligned fast path: no pad, no tail slice, no extra HBM traffic.
        x2d = boxes.reshape(rows, _LANES)
    else:
        x2d = jnp.pad(boxes.reshape(-1), (0, pad)).reshape(rows, _LANES)

    grid = (pl.cdiv(rows, block_rows),)

    out2d = pl.pallas_call(
        _clip_boxes_kernel,
        out_shape=jax.ShapeDtypeStruct((rows, _LANES), dtype),
        grid=grid,
        in_specs=[
            pl.BlockSpec((block_rows, _LANES), lambda i: (i, 0)),
            pl.BlockSpec((1, _LANES), lambda i: (0, 0)),
            pl.BlockSpec((1, _LANES), lambda i: (0, 0)),
        ],
        out_specs=pl.BlockSpec((block_rows, _LANES), lambda i: (i, 0)),
        input_output_aliases={0: 0},
        compiler_params=pltpu.CompilerParams(
            dimension_semantics=("parallel",),
        ),
    )(x2d, lower, upper)

    if pad == 0:
        return out2d.reshape(B, N, 4)
    return out2d.reshape(-1)[:n_elems].reshape(B, N, 4)


if __name__ == "__main__":
    key = jax.random.PRNGKey(0)
    k_boxes, k_img = jax.random.split(key)

    B, N = 2, 8
    C_img, H, W = 4, 16, 16

    # Boxes spread around [-8, 24] so clipping triggers on all coordinates.
    boxes = jax.random.uniform(k_boxes, (B, N, 4), dtype=jnp.float32,
                               minval=-8.0, maxval=24.0)
    img = jax.random.normal(k_img, (B, C_img, H, W), dtype=jnp.float32)

    out = clip_boxes(boxes, img)
    out = jax.block_until_ready(out)

    # Reference check (plain JAX, mirrors the PyTorch module).
    ref = boxes
    ref = ref.at[:, :, 0].set(jnp.maximum(boxes[:, :, 0], 0.0))
    ref = ref.at[:, :, 1].set(jnp.maximum(boxes[:, :, 1], 0.0))
    ref = ref.at[:, :, 2].set(jnp.minimum(boxes[:, :, 2], float(W)))
    ref = ref.at[:, :, 3].set(jnp.minimum(boxes[:, :, 3], float(H)))
    assert jnp.allclose(out, ref), "Pallas ClipBoxes mismatch vs reference"

    # Also exercise the aligned fast path (N multiple of 32 -> no pad).
    boxes2 = jax.random.uniform(jax.random.PRNGKey(1), (2, 64, 4),
                                dtype=jnp.float32, minval=-8.0, maxval=24.0)
    out2 = jax.block_until_ready(clip_boxes(boxes2, img))
    ref2 = jnp.stack(
        [jnp.maximum(boxes2[..., 0], 0.0),
         jnp.maximum(boxes2[..., 1], 0.0),
         jnp.minimum(boxes2[..., 2], float(W)),
         jnp.minimum(boxes2[..., 3], float(H))], axis=-1)
    assert jnp.allclose(out2, ref2), "Pallas ClipBoxes (aligned path) mismatch"

    print("KERNEL_OK")
</pallas_src>

<mosaic_0001>
module attributes {stable_mosaic.version = 11 : i64} {
  func.func @_clip_boxes_kernel(%arg0: i32, %arg1: memref<8x128xf32, #tpu.memory_space<vmem>>, %arg2: memref<1x128xf32, #tpu.memory_space<vmem>>, %arg3: memref<1x128xf32, #tpu.memory_space<vmem>>, %arg4: memref<8x128xf32, #tpu.memory_space<vmem>>) attributes {dimension_semantics = [#tpu.dimension_semantics<parallel>], iteration_bounds = array<i64: 1>, scalar_prefetch = 0 : i64, scratch_operands = 0 : i64, tpu.core_type = #tpu.core_type<tc>, window_params = [{transform_indices = @transform_0, window_bounds = array<i64: 8, 128>}, {pipeline_mode = #tpu.pipeline_mode<synchronous>, transform_indices = @transform_1, window_bounds = array<i64: 1, 128>}, {pipeline_mode = #tpu.pipeline_mode<synchronous>, transform_indices = @transform_2, window_bounds = array<i64: 1, 128>}, {transform_indices = @transform_3, window_bounds = array<i64: 8, 128>}]} {
    %c0 = arith.constant 0 : index
    %c0_0 = arith.constant 0 : index
    %0 = vector.load %arg1[%c0, %c0_0] : memref<8x128xf32, #tpu.memory_space<vmem>>, vector<8x128xf32>
    %c0_1 = arith.constant 0 : index
    %c0_2 = arith.constant 0 : index
    %1 = vector.load %arg2[%c0_1, %c0_2] : memref<1x128xf32, #tpu.memory_space<vmem>>, vector<1x128xf32>
    %2 = vector.broadcast %1 : vector<1x128xf32> to vector<8x128xf32>
    %3 = arith.maximumf %0, %2 : vector<8x128xf32>
    %c0_3 = arith.constant 0 : index
    %c0_4 = arith.constant 0 : index
    %4 = vector.load %arg3[%c0_3, %c0_4] : memref<1x128xf32, #tpu.memory_space<vmem>>, vector<1x128xf32>
    %5 = vector.broadcast %4 : vector<1x128xf32> to vector<8x128xf32>
    %6 = arith.minimumf %3, %5 : vector<8x128xf32>
    %c0_5 = arith.constant 0 : index
    %c0_6 = arith.constant 0 : index
    %7 = vector.load %arg4[%c0_5, %c0_6] : memref<8x128xf32, #tpu.memory_space<vmem>>, vector<8x128xf32>
    tpu.vector_store %arg4[%c0_5, %c0_6], %6 {strides = array<i32>} : memref<8x128xf32, #tpu.memory_space<vmem>>, vector<8x128xf32>,
    return
  }
  func.func @transform_0(%arg0: i32) -> (i32, i32) {
    %c0_i32 = arith.constant 0 : i32
    %c0_i32_0 = arith.constant 0 : i32
    return %arg0, %c0_i32 : i32, i32
  }
  func.func @transform_1(%arg0: i32) -> (i32, i32) {
    %c0_i32 = arith.constant 0 : i32
    %c0_i32_0 = arith.constant 0 : i32
    %c0_i32_1 = arith.constant 0 : i32
    return %c0_i32, %c0_i32_0 : i32, i32
  }
  func.func @transform_2(%arg0: i32) -> (i32, i32) {
    %c0_i32 = arith.constant 0 : i32
    %c0_i32_0 = arith.constant 0 : i32
    %c0_i32_1 = arith.constant 0 : i32
    return %c0_i32, %c0_i32_0 : i32, i32
  }
  func.func @transform_3(%arg0: i32) -> (i32, i32) {
    %c0_i32 = arith.constant 0 : i32
    %c0_i32_0 = arith.constant 0 : i32
    return %arg0, %c0_i32 : i32, i32
  }
}

</mosaic_0001>

<bundles_post_ra>
// kernel: tpu_custom_call.1
= control target key start
LH: loop header
LB: loop body
LE: loop exit
PB: predicated region body
PF: predicated region fallthrough
CT: control target
= control target key end

     0   :  { %8 = vsyncpa [#allocation3], 0  ;;  %s150_s0 = inlined_call_operand.hbm [shape: f32[1,128], index: 0, kind: input, shape index: {}, may-alias: {0,3}]   ;;  %s151_s1 = inlined_call_operand.vmem [shape: f32[1,128], index: 1, kind: input, shape index: {}]   ;;  %s152_s2 = inlined_call_operand.vmem [shape: f32[1,128], index: 2, kind: input, shape index: {}]   ;;  %s153_s3 = inlined_call_operand.hbm [shape: f32[1,128], index: 3, kind: output, shape index: {}, may-alias: {0,3}]  }
   0x1   :  { %9 = vsyncpa [#allocation4], 0 }
   0x2   :  { %14 = vsyncadd [#allocation3], 112  ;;  %s114_s12 = smov [#allocation2]  }
   0x3   :  { %s15_s13 = sshll.u32 %s114_s12, 4  ;;  %s16_s13 = int_to_ptr.vmem [resolvable:$true] %s15_s13 }
   0x4   :  { %s78_s14 = scalar_lea.vmem %s16_s13, 16  ;;  %s82_s15 = scalar_lea.vmem %s16_s13, 128 }
   0x5   :  { %p79_p0 = scmp.ne.s32.totalorder %s16_s13, %s78_s14  ;;  %p83_p1 = scmp.lt.s32.totalorder %s16_s13, %s16_s13 }
   0x6   :  { %p84_p2 = scmp.lt.s32.totalorder %s82_s15, %s78_s14 }
   0x8   :  { %p85_p3 = por %p84_p2, %p83_p1 }
   0xa   :  { %p86_p4 = pnand %p85_p3, %p79_p0 }
   0xc   :  { %89 = shalt.err (!%p86_p4)
}
   0xd   :  { %s115_s16 = smov 16   ;;  %s116_s17 = smov 1  }
   0xe   :  { %21 = dma.hbm_to_vmem [thread:$0]  %s150_s0, 16, %s16_s13, [#allocation3], %s115_s16, %s115_s16, %s116_s17  }
   0xf   :  { %110 = dma.done.wait [#allocation3], 128  }
  0x10   :  { %111 = vsyncadd [#allocation3], 4294967168  ;;  %v29_v0 = vld [vmem:[#allocation2] sm:$0xff] }
  0x11   :  { %v64_v1 = vld [vmem:[%s151_s1] ss:$0 sm:$0xff] }
  0x12   :  { %v65_v2 = vld [vmem:[%s152_s2] ss:$0 sm:$0xff]  ;;  %v37_v3 = vmax.f32 %v29_v0, %v64_v1 }
  0x14   :  { %v45_v4 = vmin.f32 %v37_v3, %v65_v2 }
  0x16   :  { %46 = vst [vmem:[#allocation5] sm:$0xff] %v45_v4 }
  0x17   :  { %51 = vsyncadd [#allocation4], 112  ;;  %s117_s24 = smov [#allocation5]  }
  0x18   :  { %s52_s25 = sshll.u32 %s117_s24, 4  ;;  %s53_s25 = int_to_ptr.vmem [resolvable:$true] %s52_s25 }
  0x19   :  { %s90_s26 = scalar_lea.vmem %s53_s25, 16  ;;  %s94_s0 = scalar_lea.vmem %s53_s25, 128 }
  0x1a   :  { %p91_p5 = scmp.ne.s32.totalorder %s53_s25, %s90_s26  ;;  %p95_p6 = scmp.lt.s32.totalorder %s53_s25, %s53_s25 }
  0x1b   :  { %p96_p7 = scmp.lt.s32.totalorder %s94_s0, %s90_s26 }
  0x1d   :  { %p97_p8 = por %p96_p7, %p95_p6 }
  0x1f   :  { %p98_p9 = pnand %p97_p8, %p91_p5 }
  0x21   :  { %101 = shalt.err (!%p98_p9)
}
  0x22   :  { %58 = dma.vmem_to_hbm [thread:$0]  %s53_s25, 16, %s153_s3, [#allocation4], %s115_s16, %s115_s16, %s116_s17  }
  0x23   :  { %112 = dma.done.wait [#allocation4], 128  }
  0x24   :  { %113 = vsyncadd [#allocation4], 4294967168 }
  0x25   :  { %62 = vsyncpa [#allocation3], 1 }
  0x26   :  { %63 = vsyncpa [#allocation4], 1 }

</bundles_post_ra>
